<compile_context>
chip_gen: v5e
topology: v5e:2x2
jax: 0.10.0
libtpu: 0.0.40
codegen_flags: <defaults>
</compile_context>

<pallas_src>
import functools

import jax
import jax.numpy as jnp
from jax import lax
from jax.experimental import pallas as pl
from jax.experimental.pallas import tpu as pltpu

GAMMA = 1.5
ALPHA = 0.25
LANES = 128
SUBLANES = 8
MAX_TM = 8192                        # rows/block: 8192*128*4B = 4 MiB per input block
VMEM_LIMIT_BYTES = 32 * 1024 * 1024  # 16 MiB live I/O buffers + headroom (< v7x 64 MiB)


def _num_tensorcores():
    """2 TensorCores per chip on v7x, 1 on v5e/v6e.  Safe fallback: 1."""
    try:
        kind = jax.devices()[0].device_kind.lower()
    except Exception:
        return 1
    return 2 if ("v7" in kind or "tpu7" in kind) else 1


def _focal_loss_kernel(pred_ref, true_ref, out_ref, acc_ref, *,
                       gamma, alpha, tm, spc, n_valid_rows, n_acc, mask_needed):
    c = pl.program_id(0)   # "parallel" (core) axis
    s = pl.program_id(1)   # "arbitrary" accumulation axis

    @pl.when(s == 0)
    def _():
        acc_ref[...] = jnp.zeros_like(acc_ref)

    x = pred_ref[...].astype(jnp.float32)
    y = true_ref[...].astype(jnp.float32)

    # BCEWithLogitsLoss(reduction='none'), numerically stable form:
    #   bce = max(x, 0) - x*y + log1p(exp(-|x|))
    e = jnp.exp(-jnp.abs(x))                      # shared with the sigmoid below
    bce = jnp.maximum(x, 0.0) - x * y + jnp.log1p(e)

    # sigmoid(x) rebuilt from e = exp(-|x|): 1/(1+e) for x>=0, e/(1+e) for x<0.
    # approx=True -> EUP vrcp slot (co-issues with exp/log1p/sqrt); tiny
    # per-element relative error that the mean reduction absorbs.
    inv_1pe = pl.reciprocal(1.0 + e, approx=True)
    sig = jnp.where(x >= 0.0, inv_1pe, e * inv_1pe)

    # 1 - p_t = y*(1-sig) + (1-y)*sig  (general / soft-label form)
    one_minus_pt = y + sig - 2.0 * y * sig
    # alpha_factor = y*alpha + (1-y)*(1-alpha), folded to 1 mul + 1 add:
    alpha_factor = (1.0 - alpha) + (2.0 * alpha - 1.0) * y
    if gamma == 1.5:
        # x**1.5 == x*sqrt(x): cheaper than pow and no pow(0, g) edge case.
        modulating = one_minus_pt * jnp.sqrt(one_minus_pt)
    else:
        # NOTE: any gamma != 1.5 falls back to the generic (slower) pow lowering.
        modulating = jnp.power(one_minus_pt, gamma)

    loss = bce * alpha_factor * modulating

    def accumulate(vals):
        # Fold the (tm,128) tile into n_acc independent (8,128) partials with
        # pure VPU adds; no per-step cross-lane reduce, and independent chains
        # help hide add latency when the VALU slot binds (v7x).
        v3 = vals.reshape(-1, SUBLANES, LANES)     # tile-aligned regroup
        per = v3.shape[0] // n_acc
        for a in range(n_acc):
            acc_ref[a] += jnp.sum(v3[a * per:(a + 1) * per], axis=0)

    if mask_needed:
        # Only ragged / duplicate (clamped) logical blocks pay for the mask.
        blk = c * spc + s
        ragged = (blk + 1) * tm > n_valid_rows

        @pl.when(jnp.logical_not(ragged))
        def _():
            accumulate(loss)

        @pl.when(ragged)
        def _():
            row = blk * tm + lax.broadcasted_iota(jnp.int32, loss.shape, 0)
            accumulate(jnp.where(row < n_valid_rows, loss, 0.0))
    else:
        accumulate(loss)

    @pl.when(s == pl.num_programs(1) - 1)
    def _():
        # One lane-dense (8,128) partial per core; final scalar reduce is done
        # by the (tiny) jnp.sum in the wrapper.
        out_ref[0] = jnp.sum(acc_ref[...], axis=0)


def _focal_terms(x, y, gamma=GAMMA, alpha=ALPHA):
    """Pure-jnp elementwise focal term (reference + ragged-tail epilogue)."""
    x = x.astype(jnp.float32)
    y = y.astype(jnp.float32)
    bce = jnp.maximum(x, 0.0) - x * y + jnp.log1p(jnp.exp(-jnp.abs(x)))
    p = jax.nn.sigmoid(x)
    p_t = y * p + (1.0 - y) * (1.0 - p)
    alpha_factor = y * alpha + (1.0 - y) * (1.0 - alpha)
    modulating = (1.0 - p_t) ** gamma
    return bce * alpha_factor * modulating


def focal_loss(pred, true, gamma=GAMMA, alpha=ALPHA, reduction="mean"):
    """Focal loss over logits `pred` and targets `true` (same shape, e.g. NCHW).

    Inputs may be any dtype (f32 / bf16 / int / bool); the cast to f32 happens
    in-VMEM, so lower-precision inputs directly cut HBM traffic.
    """
    assert pred.shape == true.shape
    n_elem = pred.size

    flat_pred = pred.reshape(-1)
    flat_true = true.reshape(-1)

    # Kernel consumes the (8*128)-aligned bulk as a lane-dense (rows,128) slab;
    # the <1024-element ragged tail (if any) is summed with a tiny jnp epilogue
    # instead of jnp.pad-ing (re-writing) both tensors in HBM.
    chunk = SUBLANES * LANES
    n_bulk = (n_elem // chunk) * chunk

    total = jnp.float32(0.0)

    if n_bulk:
        rows = n_bulk // LANES                      # multiple of 8
        pred2d = flat_pred[:n_bulk].reshape(rows, LANES)
        true2d = flat_true[:n_bulk].reshape(rows, LANES)

        tm = min(MAX_TM, rows)                      # rows % 8 == 0, so tm % 8 == 0
        total_blocks = pl.cdiv(rows, tm)            # last block may be ragged
        n_cores = min(_num_tensorcores(), total_blocks)
        spc = pl.cdiv(total_blocks, n_cores)        # grid steps per core
        mask_needed = (n_cores * spc * tm) != rows  # static: compiled out if aligned

        chunks = tm // SUBLANES
        n_acc = next((n for n in (4, 2) if chunks % n == 0), 1)

        kernel = functools.partial(
            _focal_loss_kernel, gamma=gamma, alpha=alpha, tm=tm, spc=spc,
            n_valid_rows=rows, n_acc=n_acc, mask_needed=mask_needed)

        def row_block(c, s):
            # Clamp so duplicate / out-of-range logical blocks still DMA
            # in-bounds data; they are masked (or fully zeroed) in-kernel.
            return (jnp.minimum(c * spc + s, total_blocks - 1), 0)

        partials = pl.pallas_call(
            kernel,
            out_shape=jax.ShapeDtypeStruct((n_cores, SUBLANES, LANES), jnp.float32),
            grid_spec=pltpu.PrefetchScalarGridSpec(
                num_scalar_prefetch=0,
                grid=(n_cores, spc),
                in_specs=[
                    pl.BlockSpec((tm, LANES), row_block),
                    pl.BlockSpec((tm, LANES), row_block),
                ],
                out_specs=pl.BlockSpec((1, SUBLANES, LANES), lambda c, s: (c, 0, 0)),
                scratch_shapes=[pltpu.VMEM((n_acc, SUBLANES, LANES), jnp.float32)],
            ),
            compiler_params=pltpu.CompilerParams(
                dimension_semantics=("parallel", "arbitrary"),
                vmem_limit_bytes=VMEM_LIMIT_BYTES,
            ),
        )(pred2d, true2d)

        total = total + jnp.sum(partials)           # n_cores*8*128 elems: tiny

    if n_bulk != n_elem:
        total = total + jnp.sum(
            _focal_terms(flat_pred[n_bulk:], flat_true[n_bulk:], gamma, alpha))

    if reduction == "mean":
        return total / n_elem
    elif reduction == "sum":
        return total
    else:
        # TODO(synk): reduction='none' would need an elementwise output map; the
        # wrapped BCEWithLogitsLoss default is 'mean', which is what we use.
        raise NotImplementedError("only 'mean' and 'sum' reductions supported")


def _reference_focal_loss(pred, true, gamma=GAMMA, alpha=ALPHA):
    return jnp.mean(_focal_terms(pred.reshape(-1), true.reshape(-1), gamma, alpha))


if __name__ == "__main__":
    key = jax.random.PRNGKey(0)
    k1, k2 = jax.random.split(key)

    # NCHW logits and binary targets (as in BCEWithLogitsLoss usage).
    pred = jax.random.normal(k1, (2, 4, 16, 16), dtype=jnp.float32)
    true = (jax.random.uniform(k2, (2, 4, 16, 16)) > 0.5).astype(jnp.float32)

    out = focal_loss(pred, true)
    out = jax.block_until_ready(out)

    ref = _reference_focal_loss(pred, true)
    # approx reciprocal (EUP vrcp) adds a small per-element relative error to
    # the sigmoid; the mean absorbs most of it -> compare with a loose rtol.
    assert jnp.allclose(out, ref, rtol=1e-2, atol=1e-5), (out, ref)

    print("KERNEL_OK")
</pallas_src>

<mosaic_0001>
module attributes {stable_mosaic.version = 11 : i64} {
  func.func @_focal_loss_kernel(%arg0: i32, %arg1: i32, %arg2: memref<16x128xf32, #tpu.memory_space<vmem>>, %arg3: memref<16x128xf32, #tpu.memory_space<vmem>>, %arg4: memref<1x8x128xf32, #tpu.memory_space<vmem>>, %arg5: memref<2x8x128xf32, #tpu.memory_space<vmem>>) attributes {dimension_semantics = [#tpu.dimension_semantics<parallel>, #tpu.dimension_semantics<arbitrary>], iteration_bounds = array<i64: 1, 1>, scalar_prefetch = 0 : i64, scratch_operands = 1 : i64, tpu.core_type = #tpu.core_type<tc>, window_params = [{transform_indices = @transform_0, window_bounds = array<i64: 16, 128>}, {transform_indices = @transform_1, window_bounds = array<i64: 16, 128>}, {transform_indices = @transform_2, window_bounds = array<i64: 1, 8, 128>}]} {
    %c0_i32 = arith.constant 0 : i32
    %0 = arith.cmpi eq, %arg1, %c0_i32 : i32
    %1 = arith.extui %0 : i1 to i32
    %c0_i32_0 = arith.constant 0 : i32
    %2 = arith.cmpi ne, %1, %c0_i32_0 : i32
    scf.if %2 {
      %cst_25 = arith.constant 0.000000e+00 : f32
      %55 = vector.broadcast %cst_25 : f32 to vector<2x8x128xf32>
      %c0_26 = arith.constant 0 : index
      %c0_27 = arith.constant 0 : index
      %c0_28 = arith.constant 0 : index
      %56 = vector.load %arg5[%c0_26, %c0_27, %c0_28] : memref<2x8x128xf32, #tpu.memory_space<vmem>>, vector<2x8x128xf32>
      tpu.vector_store %arg5[%c0_26, %c0_27, %c0_28], %55 {strides = array<i32>} : memref<2x8x128xf32, #tpu.memory_space<vmem>>, vector<2x8x128xf32>,
    } else {
    }
    %c0 = arith.constant 0 : index
    %c0_1 = arith.constant 0 : index
    %3 = vector.load %arg2[%c0, %c0_1] : memref<16x128xf32, #tpu.memory_space<vmem>>, vector<16x128xf32>
    %c0_2 = arith.constant 0 : index
    %c0_3 = arith.constant 0 : index
    %4 = vector.load %arg3[%c0_2, %c0_3] : memref<16x128xf32, #tpu.memory_space<vmem>>, vector<16x128xf32>
    %5 = math.absf %3 : vector<16x128xf32>
    %cst = arith.constant 0.000000e+00 : f32
    %6 = vector.broadcast %cst : f32 to vector<16x128xf32>
    %7 = arith.subf %6, %5 : vector<16x128xf32>
    %8 = math.exp %7 : vector<16x128xf32>
    %cst_4 = arith.constant 0.000000e+00 : f32
    %9 = vector.broadcast %cst_4 : f32 to vector<16x128xf32>
    %10 = arith.maximumf %3, %9 : vector<16x128xf32>
    %11 = arith.mulf %3, %4 : vector<16x128xf32>
    %12 = arith.subf %10, %11 : vector<16x128xf32>
    %13 = math.log1p %8 : vector<16x128xf32>
    %14 = arith.addf %12, %13 : vector<16x128xf32>
    %cst_5 = arith.constant 1.000000e+00 : f32
    %15 = vector.broadcast %cst_5 : f32 to vector<16x128xf32>
    %16 = arith.addf %15, %8 : vector<16x128xf32>
    %17 = tpu.reciprocal %16 {approx = true} : vector<16x128xf32> -> vector<16x128xf32>
    %cst_6 = arith.constant 0.000000e+00 : f32
    %18 = vector.broadcast %cst_6 : f32 to vector<16x128xf32>
    %19 = arith.cmpf oge, %3, %18 : vector<16x128xf32>
    %20 = arith.mulf %8, %17 : vector<16x128xf32>
    %21 = arith.select %19, %17, %20 : vector<16x128xi1>, vector<16x128xf32>
    %22 = arith.addf %4, %21 : vector<16x128xf32>
    %cst_7 = arith.constant 2.000000e+00 : f32
    %23 = vector.broadcast %cst_7 : f32 to vector<16x128xf32>
    %24 = arith.mulf %23, %4 : vector<16x128xf32>
    %25 = arith.mulf %24, %21 : vector<16x128xf32>
    %26 = arith.subf %22, %25 : vector<16x128xf32>
    %cst_8 = arith.constant -5.000000e-01 : f32
    %27 = vector.broadcast %cst_8 : f32 to vector<16x128xf32>
    %28 = arith.mulf %27, %4 : vector<16x128xf32>
    %cst_9 = arith.constant 7.500000e-01 : f32
    %29 = vector.broadcast %cst_9 : f32 to vector<16x128xf32>
    %30 = arith.addf %29, %28 : vector<16x128xf32>
    %31 = math.sqrt %26 : vector<16x128xf32>
    %32 = arith.mulf %26, %31 : vector<16x128xf32>
    %33 = arith.mulf %14, %30 : vector<16x128xf32>
    %34 = arith.mulf %33, %32 : vector<16x128xf32>
    %35 = vector.shape_cast %34 : vector<16x128xf32> to vector<2x8x128xf32>
    %c0_10 = arith.constant 0 : index
    %c0_11 = arith.constant 0 : index
    %c0_12 = arith.constant 0 : index
    %36 = vector.load %arg5[%c0_10, %c0_11, %c0_12] : memref<2x8x128xf32, #tpu.memory_space<vmem>>, vector<1x8x128xf32>
    %37 = vector.shape_cast %36 : vector<1x8x128xf32> to vector<8x128xf32>
    %38 = vector.extract_strided_slice %35 {offsets = [0, 0, 0], sizes = [1, 8, 128], strides = [1, 1, 1]} : vector<2x8x128xf32> to vector<1x8x128xf32>
    %cst_13 = arith.constant dense<0.000000e+00> : vector<8x128xf32>
    %39 = vector.multi_reduction <add>, %38, %cst_13 [0] : vector<1x8x128xf32> to vector<8x128xf32>
    %40 = arith.addf %37, %39 : vector<8x128xf32>
    %c0_14 = arith.constant 0 : index
    %c0_15 = arith.constant 0 : index
    %c0_16 = arith.constant 0 : index
    %41 = vector.load %arg5[%c0_14, %c0_15, %c0_16] : memref<2x8x128xf32, #tpu.memory_space<vmem>>, vector<1x8x128xf32>
    %42 = vector.shape_cast %41 : vector<1x8x128xf32> to vector<8x128xf32>
    %43 = vector.shape_cast %40 : vector<8x128xf32> to vector<1x8x128xf32>
    tpu.vector_store %arg5[%c0_14, %c0_15, %c0_16], %43 {strides = array<i32>} : memref<2x8x128xf32, #tpu.memory_space<vmem>>, vector<1x8x128xf32>,
    %c1 = arith.constant 1 : index
    %c0_17 = arith.constant 0 : index
    %c0_18 = arith.constant 0 : index
    %44 = vector.load %arg5[%c1, %c0_17, %c0_18] : memref<2x8x128xf32, #tpu.memory_space<vmem>>, vector<1x8x128xf32>
    %45 = vector.shape_cast %44 : vector<1x8x128xf32> to vector<8x128xf32>
    %46 = vector.extract_strided_slice %35 {offsets = [1, 0, 0], sizes = [1, 8, 128], strides = [1, 1, 1]} : vector<2x8x128xf32> to vector<1x8x128xf32>
    %cst_19 = arith.constant dense<0.000000e+00> : vector<8x128xf32>
    %47 = vector.multi_reduction <add>, %46, %cst_19 [0] : vector<1x8x128xf32> to vector<8x128xf32>
    %48 = arith.addf %45, %47 : vector<8x128xf32>
    %c1_20 = arith.constant 1 : index
    %c0_21 = arith.constant 0 : index
    %c0_22 = arith.constant 0 : index
    %49 = vector.load %arg5[%c1_20, %c0_21, %c0_22] : memref<2x8x128xf32, #tpu.memory_space<vmem>>, vector<1x8x128xf32>
    %50 = vector.shape_cast %49 : vector<1x8x128xf32> to vector<8x128xf32>
    %51 = vector.shape_cast %48 : vector<8x128xf32> to vector<1x8x128xf32>
    tpu.vector_store %arg5[%c1_20, %c0_21, %c0_22], %51 {strides = array<i32>} : memref<2x8x128xf32, #tpu.memory_space<vmem>>, vector<1x8x128xf32>,
    %c0_i32_23 = arith.constant 0 : i32
    %52 = arith.cmpi eq, %arg1, %c0_i32_23 : i32
    %53 = arith.extui %52 : i1 to i32
    %c0_i32_24 = arith.constant 0 : i32
    %54 = arith.cmpi ne, %53, %c0_i32_24 : i32
    scf.if %54 {
      %c0_25 = arith.constant 0 : index
      %c0_26 = arith.constant 0 : index
      %c0_27 = arith.constant 0 : index
      %55 = vector.load %arg5[%c0_25, %c0_26, %c0_27] : memref<2x8x128xf32, #tpu.memory_space<vmem>>, vector<2x8x128xf32>
      %cst_28 = arith.constant dense<0.000000e+00> : vector<8x128xf32>
      %56 = vector.multi_reduction <add>, %55, %cst_28 [0] : vector<2x8x128xf32> to vector<8x128xf32>
      %c0_29 = arith.constant 0 : index
      %c0_30 = arith.constant 0 : index
      %c0_31 = arith.constant 0 : index
      %57 = vector.load %arg4[%c0_29, %c0_30, %c0_31] : memref<1x8x128xf32, #tpu.memory_space<vmem>>, vector<1x8x128xf32>
      %58 = vector.shape_cast %57 : vector<1x8x128xf32> to vector<8x128xf32>
      %59 = vector.shape_cast %56 : vector<8x128xf32> to vector<1x8x128xf32>
      tpu.vector_store %arg4[%c0_29, %c0_30, %c0_31], %59 {strides = array<i32>} : memref<1x8x128xf32, #tpu.memory_space<vmem>>, vector<1x8x128xf32>,
    } else {
    }
    return
  }
  func.func @transform_0(%arg0: i32, %arg1: i32) -> (i32, i32) {
    %c1_i32 = arith.constant 1 : i32
    %0 = arith.muli %arg0, %c1_i32 : i32
    %1 = arith.addi %0, %arg1 : i32
    %c0_i32 = arith.constant 0 : i32
    %2 = arith.minsi %1, %c0_i32 : i32
    %c0_i32_0 = arith.constant 0 : i32
    %c0_i32_1 = arith.constant 0 : i32
    return %2, %c0_i32_0 : i32, i32
  }
  func.func @transform_1(%arg0: i32, %arg1: i32) -> (i32, i32) {
    %c1_i32 = arith.constant 1 : i32
    %0 = arith.muli %arg0, %c1_i32 : i32
    %1 = arith.addi %0, %arg1 : i32
    %c0_i32 = arith.constant 0 : i32
    %2 = arith.minsi %1, %c0_i32 : i32
    %c0_i32_0 = arith.constant 0 : i32
    %c0_i32_1 = arith.constant 0 : i32
    return %2, %c0_i32_0 : i32, i32
  }
  func.func @transform_2(%arg0: i32, %arg1: i32) -> (i32, i32, i32) {
    %c0_i32 = arith.constant 0 : i32
    %c0_i32_0 = arith.constant 0 : i32
    %c0_i32_1 = arith.constant 0 : i32
    return %arg0, %c0_i32, %c0_i32_0 : i32, i32, i32
  }
}

</mosaic_0001>

<bundles_post_ra>
// kernel: tpu_custom_call.1
= control target key start
LH: loop header
LB: loop body
LE: loop exit
PB: predicated region body
PF: predicated region fallthrough
CT: control target
= control target key end

     0   :  { %7 = vsyncpa [#allocation4], 0  ;;  %s350_s0 = inlined_call_operand.hbm [shape: f32[16,128], index: 0, kind: input, shape index: {}]   ;;  %s351_s1 = inlined_call_operand.hbm [shape: f32[16,128], index: 1, kind: input, shape index: {}]   ;;  %s352_s2 = inlined_call_operand.hbm [shape: f32[1,8,128], index: 2, kind: output, shape index: {}]  }
   0x1   :  { %8 = vsyncpa [#allocation7], 0 }
   0x2   :  { %9 = vsyncpa [#allocation5], 0  ;;  %s20_s11 = sshll.u32 %s350_s0, 4  ;;  %s297_s12 = smov [#allocation3]   ;;  %s21_s11 = int_to_ptr.hbm [resolvable:$true] %s20_s11 }
   0x3   :  { %s22_s13 = sshll.u32 %s297_s12, 4  ;;  %s39_s16 = sshll.u32 %s351_s1, 4  ;;  %s23_s13 = int_to_ptr.vmem [resolvable:$true] %s22_s13  ;;  %s40_s16 = int_to_ptr.hbm [resolvable:$true] %s39_s16 }
   0x4   :  { %s298_s17 = smov 128   ;;  %s299_s18 = smov 8  }
   0x5   :  { %28 = dma.hbm_to_vmem [thread:$0]  %s21_s11, 256, %s23_s13, [#allocation4], %s298_s17, %s298_s17, %s299_s18  }
   0x6   :  { %s300_s19 = smov [#allocation6]  }
   0x7   :  { %s41_s20 = sshll.u32 %s300_s19, 4  ;;  %s42_s20 = int_to_ptr.vmem [resolvable:$true] %s41_s20 }
   0x8   :  { %47 = dma.hbm_to_vmem [thread:$0]  %s40_s16, 256, %s42_s20, [#allocation7], %s298_s17, %s298_s17, %s299_s18  }
   0x9   :  { %291 = dma.done.wait [#allocation4], 256  }
   0xa   :  { %292 = vsyncadd [#allocation4], 4294967040 }
   0xb   :  { %293 = dma.done.wait [#allocation7], 256  }
   0xc   :  { %294 = vsyncadd [#allocation7], 4294967040  ;;  %v323_v0 = vld [vmem:[#allocation3] sm:$0xff]  ;;  %v325_v1 = vld [vmem:[#allocation3 + $0x8] sm:$0xff]  ;;  %s301_s0 = smov [#allocation8]   ;;  %s183_s23 = sshll.u32 %s352_s2, 4  ;;  %s184_s23 = int_to_ptr.hbm [resolvable:$true] %s183_s23 }
   0xd   :  { %v74_v2 = vand.u32 2147483647, %v323_v0  ;;  %v75_v3 = vand.u32 2147483647, %v325_v1  ;;  %v72_v12 = vld [vmem:[#allocation6] sm:$0xff]  ;;  %v73_v13 = vld [vmem:[#allocation6 + $0x8] sm:$0xff] }
   0xe   :  { %vm112_vm0 = vcmp.ge.f32.partialorder %v323_v0, 0.0  ;;  %v120_v15 = vmul.f32 2.0, %v72_v12  ;;  %vm113_vm1 = vcmp.ge.f32.partialorder %v325_v1, 0.0  ;;  %v121_v18 = vmul.f32 2.0, %v73_v13  ;;  %s181_s1 = sshll.u32 %s301_s0, 4  ;;  %s182_s1 = int_to_ptr.vmem [resolvable:$true] %s181_s1 }
   0xf   :  { %v76_v4 = vsub.f32 0.0, %v74_v2  ;;  %v77_v5 = vsub.f32 0.0, %v75_v3  ;;  %v82_v38 = vmax.f32 %v323_v0, 0.0  ;;  %v83_v39 = vmax.f32 %v325_v1, 0.0 }
  0x10   :  { %v84_v40 = vmul.f32 %v72_v12, %v323_v0  ;;  %v85_v42 = vmul.f32 %v73_v13, %v325_v1  ;;  %v126_v53 = vmul.f32 -0.5, %v72_v12  ;;  %v127_v54 = vmul.f32 -0.5, %v73_v13 }
  0x11   :  { %v78_v6 = vmul.f32 1.442695, %v76_v4  ;;  %v80_v7 = vmul.f32 1.442695, %v77_v5 }
  0x12   :  { %v86_v52 = vsub.f32 %v82_v38, %v84_v40  ;;  %v87_v56 = vsub.f32 %v83_v39, %v85_v42  ;;  %v128_v63 = vadd.f32 0.75, %v126_v53  ;;  %v129_v0 = vadd.f32 0.75, %v127_v54 }
  0x13   :  { %203 = vpow2.f32 %v78_v6 }
  0x14   :  { %205 = vpow2.f32 %v80_v7 }
  0x19   :  { %v204_v8 = vpop.eup %203 }
  0x1a   :  { %v206_v9 = vpop.eup %205  ;;  %v88_v10 = vadd.f32 1.0, %v204_v8  ;;  %v91_v28 = vmul.f32 -0.5, %v204_v8  ;;  %v94_v33 = vand.u32 2147483647, %v204_v8 }
  0x1b   :  { %v97_v11 = vadd.f32 1.0, %v206_v9  ;;  %v100_v29 = vmul.f32 -0.5, %v206_v9  ;;  %v103_v36 = vand.u32 2147483647, %v206_v9 }
  0x1c   :  { %207 = vrcp.f32 %v88_v10  ;;  %v92_v31 = vadd.f32 1.0, %v91_v28  ;;  %vm335_vm2 = vcmp.lt.f32.partialorder %v94_v33, 0.0004427343 }
  0x1d   :  { %209 = vrcp.f32 %v97_v11  ;;  %v101_v34 = vadd.f32 1.0, %v100_v29  ;;  %vm339_vm3 = vcmp.lt.f32.partialorder %v103_v36, 0.0004427343 }
  0x1e   :  { %211 = vlog2.f32 %v88_v10  ;;  %v93_v44 = vmul.f32 %v204_v8, %v92_v31 }
  0x1f   :  { %213 = vlog2.f32 %v97_v11  ;;  %v102_v48 = vmul.f32 %v206_v9, %v101_v34 }
  0x22   :  { %v208_v14 = vpop.eup %207 }
  0x23   :  { %v210_v16 = vpop.eup %209  ;;  %v114_v17 = vmul.f32 %v208_v14, %v204_v8 }
  0x24   :  { %v115_v19 = vmul.f32 %v210_v16, %v206_v9  ;;  %v212_v30 = vpop.eup %211 }
  0x25   :  { %v116_v20 = vsel %vm112_vm0, %v208_v14, %v114_v17  ;;  %v214_v32 = vpop.eup %213  ;;  %v90_v43 = vmul.f32 0.6931472, %v212_v30 }
  0x26   :  { %v117_v21 = vsel %vm113_vm1, %v210_v16, %v115_v19  ;;  %v118_v22 = vadd.f32 %v116_v20, %v72_v12  ;;  %v122_v23 = vmul.f32 %v120_v15, %v116_v20  ;;  %v99_v47 = vmul.f32 0.6931472, %v214_v32 }
  0x27   :  { %v119_v24 = vadd.f32 %v117_v21, %v73_v13  ;;  %v123_v25 = vmul.f32 %v121_v18, %v117_v21  ;;  %v96_v57 = vsel %vm335_vm2, %v93_v44, %v90_v43 }
  0x28   :  { %v124_v26 = vsub.f32 %v118_v22, %v122_v23  ;;  %v105_v59 = vsel %vm339_vm3, %v102_v48, %v99_v47  ;;  %v106_v62 = vadd.f32 %v96_v57, %v86_v52 }
  0x29   :  { %v125_v27 = vsub.f32 %v119_v24, %v123_v25  ;;  %v107_v2 = vadd.f32 %v105_v59, %v87_v56 }
  0x2a   :  { %215 = vrsqrt.f32 %v124_v26  ;;  %vm137_vm4 = vcmp.eq.f32.partialorder %v124_v26, inf  ;;  %v140_v3 = vand.u32 2147483648, %v124_v26  ;;  %vm139_vm5 = vcmp.eq.f32.partialorder %v124_v26, 0.0 }
  0x2b   :  { %217 = vrsqrt.f32 %v125_v27  ;;  %vm149_vm6 = vcmp.eq.f32.partialorder %v125_v27, inf  ;;  %v152_v6 = vand.u32 2147483648, %v125_v27  ;;  %vm151_vm7 = vcmp.eq.f32.partialorder %v125_v27, 0.0 }
  0x2c   :  { %v156_v9 = vmul.f32 %v128_v63, %v106_v62  ;;  %v157_v12 = vmul.f32 %v129_v0, %v107_v2 }
  0x30   :  { %v216_v35 = vpop.eup %215 }
  0x31   :  { %v218_v37 = vpop.eup %217  ;;  %v131_v41 = vmul.f32 %v216_v35, %v124_v26 }
  0x32   :  { %v143_v45 = vmul.f32 %v218_v37, %v125_v27 }
  0x33   :  { %v132_v49 = vmul.f32 %v216_v35, %v131_v41 }
  0x34   :  { %v144_v51 = vmul.f32 %v218_v37, %v143_v45 }
  0x35   :  { %v133_v55 = vmul.f32 0.5, %v132_v49 }
  0x36   :  { %v145_v58 = vmul.f32 0.5, %v144_v51 }
  0x37   :  { %v134_v60 = vsub.f32 1.5, %v133_v55 }
  0x38   :  { %v146_v61 = vsub.f32 1.5, %v145_v58 }
  0x39   :  { %v135_v1 = vmul.f32 %v216_v35, %v134_v60 }
  0x3a   :  { %v147_v4 = vmul.f32 %v218_v37, %v146_v61 }
  0x3b   :  { %v136_v5 = vmul.f32 %v135_v1, %v124_v26 }
  0x3c   :  { %v148_v7 = vmul.f32 %v147_v4, %v125_v27 }
  0x3d   :  { %v138_v8 = vsel %vm137_vm4, %v124_v26, %v136_v5 }
  0x3e   :  { %v141_v10 = vsel %vm139_vm5, %v140_v3, %v138_v8  ;;  %v150_v11 = vsel %vm149_vm6, %v125_v27, %v148_v7 }
  0x3f   :  { %v153_v13 = vsel %vm151_vm7, %v152_v6, %v150_v11  ;;  %v154_v14 = vmul.f32 %v141_v10, %v124_v26 }
  0x40   :  { %v155_v15 = vmul.f32 %v153_v13, %v125_v27 }
  0x41   :  { %v158_v16 = vmul.f32 %v156_v9, %v154_v14 }
  0x42   :  { %v159_v17 = vmul.f32 %v157_v12, %v155_v15 }
  0x44   :  { %v174_v18 = vadd.f32 %v159_v17, %v158_v16 }
  0x46   :  { %175 = vst [vmem:[#allocation8] sm:$0xff] %v174_v18 }
  0x47   :  { %186 = dma.vmem_to_hbm [thread:$0]  %s182_s1, 128, %s184_s23, [#allocation5]  }
  0x48   :  { %295 = dma.done.wait [#allocation5], 128  }
  0x49   :  { %296 = vsyncadd [#allocation5], 4294967168 }
  0x4a   :  { %191 = vsyncpa [#allocation4], 1 }
  0x4b   :  { %192 = vsyncpa [#allocation7], 1 }
  0x4c   :  { %193 = vsyncpa [#allocation5], 1 }

</bundles_post_ra>
